<compile_context>
chip_gen: v7x
topology: tpu7x:2x2x1
jax: 0.10.0
libtpu: 0.0.40
codegen_flags: <defaults>
</compile_context>

<pallas_src>
import functools
import math

import jax
import jax.numpy as jnp
from jax import lax
from jax.experimental import pallas as pl
from jax.experimental.pallas import tpu as pltpu

VMEM_SPEC = pl.BlockSpec(memory_space=pltpu.MemorySpace.VMEM)


# --------------------------------------------------------------------------
# Generation-aware tuning: VMEM scoped budget and row-tile ceiling derived
# from the physical VMEM of the chip (v5e/v6e: 128 MiB, v7x: 64 MiB).
# --------------------------------------------------------------------------
def _tpu_vmem_capacity():
    try:
        return int(pltpu.get_tpu_info().vmem_capacity_bytes)
    except Exception:
        return 64 * 1024 * 1024            # conservative v7x fallback


_VMEM_CAP = _tpu_vmem_capacity()
_VMEM_LIMIT = min((_VMEM_CAP * 3) // 4, 112 * 1024 * 1024)   # ~48 MiB v7x, ~96 MiB v5e/v6e
_MAX_ROW_TILE = 1024 if _VMEM_CAP >= 100 * 1024 * 1024 else 256

_ROW_PARAMS = pltpu.CompilerParams(
    dimension_semantics=("parallel",),
    vmem_limit_bytes=_VMEM_LIMIT,
)
_ATTN_PARAMS = pltpu.CompilerParams(
    dimension_semantics=("parallel", "arbitrary"),
    vmem_limit_bytes=_VMEM_LIMIT,
)


# --------------------------------------------------------------------------
# Feature probe: single-buffering of grid-invariant operands.
# --------------------------------------------------------------------------
_BUFFERED_SUPPORTED = None


def _probe_copy_kernel(x_ref, o_ref):
    o_ref[...] = x_ref[...]


def _single_buffer_supported():
    """Does this JAX build accept pipeline_mode=pl.Buffered(1) in pallas_call?"""
    global _BUFFERED_SUPPORTED
    if _BUFFERED_SUPPORTED is None:
        try:
            spec = pl.BlockSpec((8, 128), lambda i: (0, 0),
                                pipeline_mode=pl.Buffered(1))
            out = pl.pallas_call(
                _probe_copy_kernel,
                out_shape=jax.ShapeDtypeStruct((8, 128), jnp.float32),
                grid=(1,),
                in_specs=[spec],
                out_specs=pl.BlockSpec((8, 128), lambda i: (0, 0)),
            )(jnp.zeros((8, 128), jnp.float32))
            jax.block_until_ready(out)
            _BUFFERED_SUPPORTED = True
        except Exception:
            _BUFFERED_SUPPORTED = False
    return _BUFFERED_SUPPORTED


def _invariant_spec(block_shape, index_map):
    # Grid-invariant operands (constant index_map): double-buffering only
    # doubles VMEM residency with zero overlap benefit -> single-buffer when
    # supported by the running JAX build.
    if _single_buffer_supported():
        return pl.BlockSpec(block_shape, index_map, pipeline_mode=pl.Buffered(1))
    return pl.BlockSpec(block_shape, index_map)


# ----------------------------- Pallas kernels ------------------------------

def _attn_layer_kernel(x_ref, ln_ref, wq_ref, wk_ref, wv_ref, bias_ref,
                       mask_ref, wo_ref, o_ref):
    # Grid = (batch, head).  One head's full sub-layer work per step:
    # RMSNorm(ln1) + per-head Q/K/V projection + T5 attention (+rel-pos bias,
    # +mask, NO 1/sqrt(d) scaling) + per-head slice of the output projection,
    # accumulated into the resident (S, D) output block (init = residual).
    h = pl.program_id(1)

    # Residual + RMSNorm of the input slab.  Recomputed per head: pure VPU
    # work, cheap next to the matmuls, and it keeps QKV entirely out of HBM.
    x = x_ref[...].astype(jnp.float32)                                  # (S, D)
    var = jnp.mean(x * x, axis=-1, keepdims=True)
    normed = ((x * lax.rsqrt(var + 1e-6)) * ln_ref[...]).astype(jnp.bfloat16)

    # Head-aligned weight tiles delivered by BlockSpec index_map: no in-kernel
    # lane slicing at d_kv granularity.
    q = jnp.dot(normed, wq_ref[...], preferred_element_type=jnp.float32)  # (S, d_kv)
    k = jnp.dot(normed, wk_ref[...], preferred_element_type=jnp.float32)
    v = jnp.dot(normed, wv_ref[...], preferred_element_type=jnp.float32)

    # q @ k.T without an explicit transpose (contract last dims).
    s = lax.dot_general(q.astype(jnp.bfloat16), k.astype(jnp.bfloat16),
                        (((1,), (1,)), ((), ())),
                        preferred_element_type=jnp.float32)               # (S, S)
    s = s + bias_ref[...].astype(jnp.float32) + mask_ref[...]
    m = jnp.max(s, axis=-1, keepdims=True)
    p = jnp.exp(s - m)
    p = p * pl.reciprocal(jnp.sum(p, axis=-1, keepdims=True), approx=True)
    ctx = jnp.dot(p.astype(jnp.bfloat16), v.astype(jnp.bfloat16),
                  preferred_element_type=jnp.float32)                     # (S, d_kv)

    @pl.when(h == 0)
    def _():
        o_ref[...] = x                                                    # residual

    o_ref[...] += jnp.dot(ctx.astype(jnp.bfloat16), wo_ref[...],
                          preferred_element_type=jnp.float32)             # (S, D)


def fused_attention_layer(x, ln_w, wq, wk, wv, pos_bias, mask_add, wo):
    # x: (B, S, D) f32 residual stream; ln_w: (1, D) f32
    # wq/wk/wv: (H, D, d_kv) bf16; wo: (H, d_kv, D) bf16
    # pos_bias: (H, S, S) bf16; mask_add: (B, 1, S) f32
    b, s, d = x.shape
    h, _, d_kv = wq.shape
    return pl.pallas_call(
        _attn_layer_kernel,
        out_shape=jax.ShapeDtypeStruct((b, s, d), jnp.float32),
        grid=(b, h),
        in_specs=[
            pl.BlockSpec((None, s, d), lambda i, j: (i, 0, 0)),        # x (per batch)
            _invariant_spec((1, d), lambda i, j: (0, 0)),              # ln1 scale
            pl.BlockSpec((None, d, d_kv), lambda i, j: (j, 0, 0)),     # wq (per head)
            pl.BlockSpec((None, d, d_kv), lambda i, j: (j, 0, 0)),     # wk (per head)
            pl.BlockSpec((None, d, d_kv), lambda i, j: (j, 0, 0)),     # wv (per head)
            pl.BlockSpec((None, s, s), lambda i, j: (j, 0, 0)),        # rel-pos bias (per head)
            pl.BlockSpec((None, 1, s), lambda i, j: (i, 0, 0)),        # additive mask (per batch)
            pl.BlockSpec((None, d_kv, d), lambda i, j: (j, 0, 0)),     # wo slice (per head)
        ],
        out_specs=pl.BlockSpec((None, s, d), lambda i, j: (i, 0, 0)),
        compiler_params=_ATTN_PARAMS,
    )(x, ln_w, wq, wk, wv, pos_bias, mask_add, wo)


def _ln_ffn_kernel(x_ref, w_ref, wi_ref, wo_ref, o_ref):
    # T5LayerFF: x + wo(relu(wi(RMSNorm(x)))) — all fused, residual in f32.
    x = x_ref[...].astype(jnp.float32)
    var = jnp.mean(x * x, axis=-1, keepdims=True)
    normed = ((x * lax.rsqrt(var + 1e-6)) * w_ref[...]).astype(jnp.bfloat16)
    hid = jnp.dot(normed, wi_ref[...], preferred_element_type=jnp.float32)
    hid = jnp.maximum(hid, 0.0).astype(jnp.bfloat16)
    o_ref[...] = jnp.dot(hid, wo_ref[...], preferred_element_type=jnp.float32) + x
    # TODO(synk): at very large d_model/d_ff the contraction dims should also be
    # K-tiled with a VMEM accumulator; at T5-base/large sizes full-width weights
    # plus a 256-1024 row tile fit the generation-aware VMEM budget.


def fused_ln_ffn(x, ln_w, wi, wo):
    # x: (M, D) f32, wi: (D, d_ff) bf16, wo: (d_ff, D) bf16
    m, d = x.shape
    dff = wi.shape[1]
    tm = min(_MAX_ROW_TILE, max(int(pl.next_power_of_2(m)), 8))
    m_pad = pl.cdiv(m, tm) * tm                  # pad instead of full-M fallback
    xp = jnp.pad(x, ((0, m_pad - m), (0, 0))) if m_pad != m else x
    out = pl.pallas_call(
        _ln_ffn_kernel,
        out_shape=jax.ShapeDtypeStruct((m_pad, d), jnp.float32),
        grid=(m_pad // tm,),
        in_specs=[
            pl.BlockSpec((tm, d), lambda i: (i, 0)),
            _invariant_spec((1, d), lambda i: (0, 0)),
            _invariant_spec((d, dff), lambda i: (0, 0)),
            _invariant_spec((dff, d), lambda i: (0, 0)),
        ],
        out_specs=pl.BlockSpec((tm, d), lambda i: (i, 0)),
        compiler_params=_ROW_PARAMS,
    )(xp, ln_w, wi, wo)
    return out[:m] if m_pad != m else out


def _final_head_kernel(x_ref, ln_ref, cw_ref, cb_ref, o_ref):
    # Final RMSNorm (token-0 rows only — exact, since RMSNorm is per-position)
    # fused with nn.Linear(d_model, 1): sum over features + bias.
    x = x_ref[...].astype(jnp.float32)
    var = jnp.mean(x * x, axis=-1, keepdims=True)
    normed = x * lax.rsqrt(var + 1e-6) * ln_ref[...]
    o_ref[...] = jnp.sum(normed * cw_ref[...], axis=-1, keepdims=True) + cb_ref[...]


def final_head(h0, ln_w, cls_w, cls_b):
    # h0: (B, D) f32, ln_w/cls_w: (1, D) f32, cls_b: (1, 1) f32 -> (B, 1)
    bsz = h0.shape[0]
    return pl.pallas_call(
        _final_head_kernel,
        out_shape=jax.ShapeDtypeStruct((bsz, 1), jnp.float32),
        in_specs=[VMEM_SPEC, VMEM_SPEC, VMEM_SPEC, VMEM_SPEC],
        out_specs=VMEM_SPEC,
    )(h0, ln_w, cls_w, cls_b)


# ------------------------------- JAX glue -----------------------------------

def _relative_position_bucket(relative_position, num_buckets=32, max_distance=128):
    # Bidirectional (encoder) bucketing, matching HF T5Attention._relative_position_bucket
    num_buckets = num_buckets // 2
    relative_buckets = (relative_position > 0).astype(jnp.int32) * num_buckets
    relative_position = jnp.abs(relative_position)
    max_exact = num_buckets // 2
    is_small = relative_position < max_exact
    rel_pos_f = jnp.maximum(relative_position, 1).astype(jnp.float32)  # guard log(0); masked by is_small
    rel_if_large = max_exact + (
        jnp.log(rel_pos_f / max_exact)
        / math.log(max_distance / max_exact)
        * (num_buckets - max_exact)
    ).astype(jnp.int32)
    rel_if_large = jnp.minimum(rel_if_large, num_buckets - 1)
    return relative_buckets + jnp.where(is_small, relative_position, rel_if_large)


def init_params(key, *, vocab, d_model, d_kv, num_heads, d_ff, num_layers, num_buckets):
    keys = iter(jax.random.split(key, 8 + 8 * num_layers))

    def nrm(shape, scale=0.02):
        return (scale * jax.random.normal(next(keys), shape)).astype(jnp.float32)

    params = {
        "embedding": nrm((vocab, d_model), 1.0),
        "rel_bias": nrm((num_buckets, num_heads), 0.5),   # relative_attention_bias table
        "final_ln": jnp.ones((1, d_model), jnp.float32),
        "cls_w": nrm((1, d_model)),                       # nn.Linear(d_model, 1) weight
        "cls_b": jnp.zeros((1, 1), jnp.float32),          # nn.Linear(d_model, 1) bias
        "layers": [],
    }
    for _ in range(num_layers):
        # Projection weights stored head-major, pre-transposed to (in, out), bf16:
        #   wq/wk/wv: (H, D, d_kv) ; wo: (H, d_kv, D) so each grid step's BlockSpec
        # delivers a head-aligned tile (no lane slicing inside the kernel).
        params["layers"].append({
            "ln1": jnp.ones((1, d_model), jnp.float32),
            "wq": nrm((num_heads, d_model, d_kv)).astype(jnp.bfloat16),
            "wk": nrm((num_heads, d_model, d_kv)).astype(jnp.bfloat16),
            "wv": nrm((num_heads, d_model, d_kv)).astype(jnp.bfloat16),
            "wo_attn": nrm((num_heads, d_kv, d_model)).astype(jnp.bfloat16),
            "ln2": jnp.ones((1, d_model), jnp.float32),
            "wi": nrm((d_model, d_ff)).astype(jnp.bfloat16),
            "wo_ffn": nrm((d_ff, d_model)).astype(jnp.bfloat16),
        })
    return params


def t5_binary_cls_forward(cfg, params, input_ids, attention_mask):
    B, S = input_ids.shape
    D = cfg["d_model"]

    # --- embedding lookup (glue) ---
    x = jnp.take(params["embedding"], input_ids, axis=0)            # (B, S, D) f32

    # --- relative position bias (H, S, S) bf16 + per-batch additive mask (B, 1, S) ---
    ctx = jnp.arange(S)[:, None]
    mem = jnp.arange(S)[None, :]
    buckets = _relative_position_bucket(mem - ctx, cfg["num_buckets"], cfg["max_distance"])
    pos_bias = jnp.take(params["rel_bias"], buckets, axis=0)        # (S, S, H)
    pos_bias = jnp.transpose(pos_bias, (2, 0, 1)).astype(jnp.bfloat16)  # (H, S, S)
    # Finite sentinel (not -inf): fully padded rows stay NaN-free.
    mask_add = ((1.0 - attention_mask.astype(jnp.float32)) * (-1e9))[:, None, :]

    for layer in params["layers"]:
        # Self-attention sub-layer: RMSNorm + per-head QKV + attention +
        # output projection + residual, all in one kernel (grid = (B, H)).
        x = fused_attention_layer(x, layer["ln1"], layer["wq"], layer["wk"],
                                  layer["wv"], pos_bias, mask_add,
                                  layer["wo_attn"])                  # (B, S, D)
        # Feed-forward sub-layer: RMSNorm + wi/ReLU/wo + residual, row-tiled.
        x = fused_ln_ffn(x.reshape(B * S, D), layer["ln2"],
                         layer["wi"], layer["wo_ffn"]).reshape(B, S, D)

    # --- final layer norm (token 0 only) + classifier head, fused ---
    h0 = x[:, 0, :]                                                  # (B, D)
    logits = final_head(h0, params["final_ln"], params["cls_w"], params["cls_b"])
    return logits[:, 0]                                              # (B,)
    # TODO(synk): dropout layers of the T5 encoder are eval-mode no-ops and are omitted.


# --------------------------------- main --------------------------------------

if __name__ == "__main__":
    cfg = dict(
        vocab=64, d_model=32, d_kv=8, num_heads=4, d_ff=64,
        num_layers=2, num_buckets=32, max_distance=128,
    )
    B, S = 2, 8

    # Probe the single-buffering feature eagerly (outside any jit trace).
    _single_buffer_supported()

    key = jax.random.PRNGKey(0)
    k_param, k_ids = jax.random.split(key)
    params = init_params(
        k_param,
        vocab=cfg["vocab"], d_model=cfg["d_model"], d_kv=cfg["d_kv"],
        num_heads=cfg["num_heads"], d_ff=cfg["d_ff"],
        num_layers=cfg["num_layers"], num_buckets=cfg["num_buckets"],
    )

    input_ids = jax.random.randint(k_ids, (B, S), 0, cfg["vocab"], dtype=jnp.int32)
    attention_mask = jnp.array(
        [[1, 1, 1, 1, 1, 1, 1, 1],
         [1, 1, 1, 1, 1, 0, 0, 0]], dtype=jnp.int32)

    fwd = jax.jit(functools.partial(t5_binary_cls_forward, cfg))
    logits = fwd(params, input_ids, attention_mask)
    jax.block_until_ready(logits)

    assert logits.shape == (B,) and logits.dtype == jnp.float32
    assert bool(jnp.all(jnp.isfinite(logits)))
    print("KERNEL_OK")
</pallas_src>

<mosaic_0001>
module attributes {stable_mosaic.version = 11 : i64} {
  func.func @_probe_copy_kernel(%arg0: i32, %arg1: memref<8x128xf32, #tpu.memory_space<vmem>>, %arg2: memref<8x128xf32, #tpu.memory_space<vmem>>) attributes {dimension_semantics = [#tpu.dimension_semantics<arbitrary>], iteration_bounds = array<i64: 1>, scalar_prefetch = 0 : i64, scratch_operands = 0 : i64, tpu.core_type = #tpu.core_type<tc>, window_params = [{pipeline_mode = #tpu.pipeline_mode<synchronous>, transform_indices = @transform_0, window_bounds = array<i64: 8, 128>}, {pipeline_mode = #tpu.pipeline_mode<synchronous>, transform_indices = @transform_1, window_bounds = array<i64: 8, 128>}]} {
    %c0 = arith.constant 0 : index
    %c0_0 = arith.constant 0 : index
    %0 = vector.load %arg1[%c0, %c0_0] : memref<8x128xf32, #tpu.memory_space<vmem>>, vector<8x128xf32>
    %c0_1 = arith.constant 0 : index
    %c0_2 = arith.constant 0 : index
    %1 = vector.load %arg2[%c0_1, %c0_2] : memref<8x128xf32, #tpu.memory_space<vmem>>, vector<8x128xf32>
    tpu.vector_store %arg2[%c0_1, %c0_2], %0 {strides = array<i32>} : memref<8x128xf32, #tpu.memory_space<vmem>>, vector<8x128xf32>,
    return
  }
  func.func @transform_0(%arg0: i32) -> (i32, i32) {
    %c0_i32 = arith.constant 0 : i32
    %c0_i32_0 = arith.constant 0 : i32
    %c0_i32_1 = arith.constant 0 : i32
    return %c0_i32, %c0_i32_0 : i32, i32
  }
  func.func @transform_1(%arg0: i32) -> (i32, i32) {
    %c0_i32 = arith.constant 0 : i32
    %c0_i32_0 = arith.constant 0 : i32
    %c0_i32_1 = arith.constant 0 : i32
    return %c0_i32, %c0_i32_0 : i32, i32
  }
}

module attributes {stable_mosaic.version = 11 : i64} {
  func.func @_final_head_kernel(%arg0: memref<2x32xf32, #tpu.memory_space<vmem>>, %arg1: memref<1x32xf32, #tpu.memory_space<vmem>>, %arg2: memref<1x32xf32, #tpu.memory_space<vmem>>, %arg3: memref<1x1xf32, #tpu.memory_space<vmem>>, %arg4: memref<2x1xf32, #tpu.memory_space<vmem>>) attributes {dimension_semantics = [], scalar_prefetch = 0 : i64, scratch_operands = 0 : i64, tpu.core_type = #tpu.core_type<tc>} {
    %c0 = arith.constant 0 : index
    %c0_0 = arith.constant 0 : index
    %0 = vector.load %arg0[%c0, %c0_0] : memref<2x32xf32, #tpu.memory_space<vmem>>, vector<2x32xf32>
    %1 = arith.mulf %0, %0 : vector<2x32xf32>
    %cst = arith.constant dense<0.000000e+00> : vector<2xf32>
    %2 = vector.multi_reduction <add>, %1, %cst [1] : vector<2x32xf32> to vector<2xf32>
    %3 = vector.shape_cast %2 : vector<2xf32> to vector<2x1xf32>
    %cst_1 = arith.constant 3.200000e+01 : f32
    %4 = vector.broadcast %cst_1 : f32 to vector<2x1xf32>
    %5 = arith.divf %3, %4 : vector<2x1xf32>
    %cst_2 = arith.constant 9.99999997E-7 : f32
    %6 = vector.broadcast %cst_2 : f32 to vector<2x1xf32>
    %7 = arith.addf %5, %6 : vector<2x1xf32>
    %8 = math.rsqrt %7 : vector<2x1xf32>
    %9 = vector.broadcast %8 : vector<2x1xf32> to vector<2x32xf32>
    %10 = arith.mulf %0, %9 : vector<2x32xf32>
    %c0_3 = arith.constant 0 : index
    %c0_4 = arith.constant 0 : index
    %11 = vector.load %arg1[%c0_3, %c0_4] : memref<1x32xf32, #tpu.memory_space<vmem>>, vector<1x32xf32>
    %12 = vector.broadcast %11 : vector<1x32xf32> to vector<2x32xf32>
    %13 = arith.mulf %10, %12 : vector<2x32xf32>
    %c0_5 = arith.constant 0 : index
    %c0_6 = arith.constant 0 : index
    %14 = vector.load %arg2[%c0_5, %c0_6] : memref<1x32xf32, #tpu.memory_space<vmem>>, vector<1x32xf32>
    %15 = vector.broadcast %14 : vector<1x32xf32> to vector<2x32xf32>
    %16 = arith.mulf %13, %15 : vector<2x32xf32>
    %cst_7 = arith.constant dense<0.000000e+00> : vector<2xf32>
    %17 = vector.multi_reduction <add>, %16, %cst_7 [1] : vector<2x32xf32> to vector<2xf32>
    %18 = vector.shape_cast %17 : vector<2xf32> to vector<2x1xf32>
    %c0_8 = arith.constant 0 : index
    %c0_9 = arith.constant 0 : index
    %19 = vector.load %arg3[%c0_8, %c0_9] : memref<1x1xf32, #tpu.memory_space<vmem>>, vector<1x1xf32>
    %20 = vector.broadcast %19 : vector<1x1xf32> to vector<2x1xf32>
    %21 = arith.addf %18, %20 : vector<2x1xf32>
    %c0_10 = arith.constant 0 : index
    %c0_11 = arith.constant 0 : index
    %22 = vector.load %arg4[%c0_10, %c0_11] : memref<2x1xf32, #tpu.memory_space<vmem>>, vector<2x1xf32>
    tpu.vector_store %arg4[%c0_10, %c0_11], %21 {strides = array<i32>} : memref<2x1xf32, #tpu.memory_space<vmem>>, vector<2x1xf32>,
    return
  }
}

module attributes {stable_mosaic.version = 11 : i64} {
  func.func @_ln_ffn_kernel(%arg0: i32, %arg1: memref<16x32xf32, #tpu.memory_space<vmem>>, %arg2: memref<1x32xf32, #tpu.memory_space<vmem>>, %arg3: memref<32x64xbf16, #tpu.memory_space<vmem>>, %arg4: memref<64x32xbf16, #tpu.memory_space<vmem>>, %arg5: memref<16x32xf32, #tpu.memory_space<vmem>>) attributes {dimension_semantics = [#tpu.dimension_semantics<parallel>], iteration_bounds = array<i64: 1>, scalar_prefetch = 0 : i64, scratch_operands = 0 : i64, tpu.core_type = #tpu.core_type<tc>, window_params = [{transform_indices = @transform_0, window_bounds = array<i64: 16, 32>}, {pipeline_mode = #tpu.pipeline_mode<synchronous>, transform_indices = @transform_1, window_bounds = array<i64: 1, 32>}, {pipeline_mode = #tpu.pipeline_mode<synchronous>, transform_indices = @transform_2, window_bounds = array<i64: 32, 64>}, {pipeline_mode = #tpu.pipeline_mode<synchronous>, transform_indices = @transform_3, window_bounds = array<i64: 64, 32>}, {transform_indices = @transform_4, window_bounds = array<i64: 16, 32>}]} {
    %c0 = arith.constant 0 : index
    %c0_0 = arith.constant 0 : index
    %0 = vector.load %arg1[%c0, %c0_0] : memref<16x32xf32, #tpu.memory_space<vmem>>, vector<16x32xf32>
    %1 = arith.mulf %0, %0 : vector<16x32xf32>
    %cst = arith.constant dense<0.000000e+00> : vector<16xf32>
    %2 = vector.multi_reduction <add>, %1, %cst [1] : vector<16x32xf32> to vector<16xf32>
    %3 = vector.shape_cast %2 : vector<16xf32> to vector<16x1xf32>
    %cst_1 = arith.constant 3.200000e+01 : f32
    %4 = vector.broadcast %cst_1 : f32 to vector<16x1xf32>
    %5 = arith.divf %3, %4 : vector<16x1xf32>
    %cst_2 = arith.constant 9.99999997E-7 : f32
    %6 = vector.broadcast %cst_2 : f32 to vector<16x1xf32>
    %7 = arith.addf %5, %6 : vector<16x1xf32>
    %8 = math.rsqrt %7 : vector<16x1xf32>
    %9 = vector.broadcast %8 : vector<16x1xf32> to vector<16x32xf32>
    %10 = arith.mulf %0, %9 : vector<16x32xf32>
    %c0_3 = arith.constant 0 : index
    %c0_4 = arith.constant 0 : index
    %11 = vector.load %arg2[%c0_3, %c0_4] : memref<1x32xf32, #tpu.memory_space<vmem>>, vector<1x32xf32>
    %12 = vector.broadcast %11 : vector<1x32xf32> to vector<16x32xf32>
    %13 = arith.mulf %10, %12 : vector<16x32xf32>
    %14 = arith.truncf %13 : vector<16x32xf32> to vector<16x32xbf16>
    %c0_5 = arith.constant 0 : index
    %c0_6 = arith.constant 0 : index
    %15 = vector.load %arg3[%c0_5, %c0_6] : memref<32x64xbf16, #tpu.memory_space<vmem>>, vector<32x64xbf16>
    %cst_7 = arith.constant dense<0.000000e+00> : vector<16x64xf32>
    %16 = tpu.matmul %14, %15, %cst_7 {dimension_numbers = #tpu.dot_dimension_numbers<[1], [0], [0], [1], [0, 0, 1, 1], [], []>} : vector<16x32xbf16>, vector<32x64xbf16>, vector<16x64xf32> -> vector<16x64xf32>
    %cst_8 = arith.constant 0.000000e+00 : f32
    %17 = vector.broadcast %cst_8 : f32 to vector<16x64xf32>
    %18 = arith.maximumf %16, %17 : vector<16x64xf32>
    %19 = arith.truncf %18 : vector<16x64xf32> to vector<16x64xbf16>
    %c0_9 = arith.constant 0 : index
    %c0_10 = arith.constant 0 : index
    %20 = vector.load %arg4[%c0_9, %c0_10] : memref<64x32xbf16, #tpu.memory_space<vmem>>, vector<64x32xbf16>
    %cst_11 = arith.constant dense<0.000000e+00> : vector<16x32xf32>
    %21 = tpu.matmul %19, %20, %cst_11 {dimension_numbers = #tpu.dot_dimension_numbers<[1], [0], [0], [1], [0, 0, 1, 1], [], []>} : vector<16x64xbf16>, vector<64x32xbf16>, vector<16x32xf32> -> vector<16x32xf32>
    %22 = arith.addf %21, %0 : vector<16x32xf32>
    %c0_12 = arith.constant 0 : index
    %c0_13 = arith.constant 0 : index
    %23 = vector.load %arg5[%c0_12, %c0_13] : memref<16x32xf32, #tpu.memory_space<vmem>>, vector<16x32xf32>
    tpu.vector_store %arg5[%c0_12, %c0_13], %22 {strides = array<i32>} : memref<16x32xf32, #tpu.memory_space<vmem>>, vector<16x32xf32>,
    return
  }
  func.func @transform_0(%arg0: i32) -> (i32, i32) {
    %c0_i32 = arith.constant 0 : i32
    %c0_i32_0 = arith.constant 0 : i32
    return %arg0, %c0_i32 : i32, i32
  }
  func.func @transform_1(%arg0: i32) -> (i32, i32) {
    %c0_i32 = arith.constant 0 : i32
    %c0_i32_0 = arith.constant 0 : i32
    %c0_i32_1 = arith.constant 0 : i32
    return %c0_i32, %c0_i32_0 : i32, i32
  }
  func.func @transform_2(%arg0: i32) -> (i32, i32) {
    %c0_i32 = arith.constant 0 : i32
    %c0_i32_0 = arith.constant 0 : i32
    %c0_i32_1 = arith.constant 0 : i32
    return %c0_i32, %c0_i32_0 : i32, i32
  }
  func.func @transform_3(%arg0: i32) -> (i32, i32) {
    %c0_i32 = arith.constant 0 : i32
    %c0_i32_0 = arith.constant 0 : i32
    %c0_i32_1 = arith.constant 0 : i32
    return %c0_i32, %c0_i32_0 : i32, i32
  }
  func.func @transform_4(%arg0: i32) -> (i32, i32) {
    %c0_i32 = arith.constant 0 : i32
    %c0_i32_0 = arith.constant 0 : i32
    return %arg0, %c0_i32 : i32, i32
  }
}

module attributes {stable_mosaic.version = 11 : i64} {
  func.func @_attn_layer_kernel(%arg0: i32, %arg1: i32, %arg2: memref<1x8x32xf32, #tpu.memory_space<vmem>>, %arg3: memref<1x32xf32, #tpu.memory_space<vmem>>, %arg4: memref<1x32x8xbf16, #tpu.memory_space<vmem>>, %arg5: memref<1x32x8xbf16, #tpu.memory_space<vmem>>, %arg6: memref<1x32x8xbf16, #tpu.memory_space<vmem>>, %arg7: memref<1x8x8xbf16, #tpu.memory_space<vmem>>, %arg8: memref<1x1x8xf32, #tpu.memory_space<vmem>>, %arg9: memref<1x8x32xbf16, #tpu.memory_space<vmem>>, %arg10: memref<1x8x32xf32, #tpu.memory_space<vmem>>) attributes {dimension_semantics = [#tpu.dimension_semantics<parallel>, #tpu.dimension_semantics<arbitrary>], iteration_bounds = array<i64: 2, 4>, scalar_prefetch = 0 : i64, scratch_operands = 0 : i64, tpu.core_type = #tpu.core_type<tc>, window_params = [{transform_indices = @transform_0, window_bounds = array<i64: 1, 8, 32>}, {pipeline_mode = #tpu.pipeline_mode<synchronous>, transform_indices = @transform_1, window_bounds = array<i64: 1, 32>}, {transform_indices = @transform_2, window_bounds = array<i64: 1, 32, 8>}, {transform_indices = @transform_3, window_bounds = array<i64: 1, 32, 8>}, {transform_indices = @transform_4, window_bounds = array<i64: 1, 32, 8>}, {transform_indices = @transform_5, window_bounds = array<i64: 1, 8, 8>}, {transform_indices = @transform_6, window_bounds = array<i64: 1, 1, 8>}, {transform_indices = @transform_7, window_bounds = array<i64: 1, 8, 32>}, {transform_indices = @transform_8, window_bounds = array<i64: 1, 8, 32>}]} {
    %c0 = arith.constant 0 : index
    %c0_0 = arith.constant 0 : index
    %c0_1 = arith.constant 0 : index
    %0 = vector.load %arg2[%c0, %c0_0, %c0_1] : memref<1x8x32xf32, #tpu.memory_space<vmem>>, vector<1x8x32xf32>
    %1 = vector.shape_cast %0 : vector<1x8x32xf32> to vector<8x32xf32>
    %2 = arith.mulf %1, %1 : vector<8x32xf32>
    %cst = arith.constant dense<0.000000e+00> : vector<8xf32>
    %3 = vector.multi_reduction <add>, %2, %cst [1] : vector<8x32xf32> to vector<8xf32>
    %4 = vector.shape_cast %3 : vector<8xf32> to vector<8x1xf32>
    %cst_2 = arith.constant 3.200000e+01 : f32
    %5 = vector.broadcast %cst_2 : f32 to vector<8x1xf32>
    %6 = arith.divf %4, %5 : vector<8x1xf32>
    %cst_3 = arith.constant 9.99999997E-7 : f32
    %7 = vector.broadcast %cst_3 : f32 to vector<8x1xf32>
    %8 = arith.addf %6, %7 : vector<8x1xf32>
    %9 = math.rsqrt %8 : vector<8x1xf32>
    %10 = vector.broadcast %9 : vector<8x1xf32> to vector<8x32xf32>
    %11 = arith.mulf %1, %10 : vector<8x32xf32>
    %c0_4 = arith.constant 0 : index
    %c0_5 = arith.constant 0 : index
    %12 = vector.load %arg3[%c0_4, %c0_5] : memref<1x32xf32, #tpu.memory_space<vmem>>, vector<1x32xf32>
    %13 = vector.broadcast %12 : vector<1x32xf32> to vector<8x32xf32>
    %14 = arith.mulf %11, %13 : vector<8x32xf32>
    %15 = arith.truncf %14 : vector<8x32xf32> to vector<8x32xbf16>
    %c0_6 = arith.constant 0 : index
    %c0_7 = arith.constant 0 : index
    %c0_8 = arith.constant 0 : index
    %16 = vector.load %arg4[%c0_6, %c0_7, %c0_8] : memref<1x32x8xbf16, #tpu.memory_space<vmem>>, vector<1x32x8xbf16>
    %17 = vector.shape_cast %16 : vector<1x32x8xbf16> to vector<32x8xbf16>
    %cst_9 = arith.constant dense<0.000000e+00> : vector<8x8xf32>
    %18 = tpu.matmul %15, %17, %cst_9 {dimension_numbers = #tpu.dot_dimension_numbers<[1], [0], [0], [1], [0, 0, 1, 1], [], []>} : vector<8x32xbf16>, vector<32x8xbf16>, vector<8x8xf32> -> vector<8x8xf32>
    %c0_10 = arith.constant 0 : index
    %c0_11 = arith.constant 0 : index
    %c0_12 = arith.constant 0 : index
    %19 = vector.load %arg5[%c0_10, %c0_11, %c0_12] : memref<1x32x8xbf16, #tpu.memory_space<vmem>>, vector<1x32x8xbf16>
    %20 = vector.shape_cast %19 : vector<1x32x8xbf16> to vector<32x8xbf16>
    %cst_13 = arith.constant dense<0.000000e+00> : vector<8x8xf32>
    %21 = tpu.matmul %15, %20, %cst_13 {dimension_numbers = #tpu.dot_dimension_numbers<[1], [0], [0], [1], [0, 0, 1, 1], [], []>} : vector<8x32xbf16>, vector<32x8xbf16>, vector<8x8xf32> -> vector<8x8xf32>
    %c0_14 = arith.constant 0 : index
    %c0_15 = arith.constant 0 : index
    %c0_16 = arith.constant 0 : index
    %22 = vector.load %arg6[%c0_14, %c0_15, %c0_16] : memref<1x32x8xbf16, #tpu.memory_space<vmem>>, vector<1x32x8xbf16>
    %23 = vector.shape_cast %22 : vector<1x32x8xbf16> to vector<32x8xbf16>
    %cst_17 = arith.constant dense<0.000000e+00> : vector<8x8xf32>
    %24 = tpu.matmul %15, %23, %cst_17 {dimension_numbers = #tpu.dot_dimension_numbers<[1], [0], [0], [1], [0, 0, 1, 1], [], []>} : vector<8x32xbf16>, vector<32x8xbf16>, vector<8x8xf32> -> vector<8x8xf32>
    %25 = arith.truncf %18 : vector<8x8xf32> to vector<8x8xbf16>
    %26 = arith.truncf %21 : vector<8x8xf32> to vector<8x8xbf16>
    %cst_18 = arith.constant dense<0.000000e+00> : vector<8x8xf32>
    %27 = tpu.matmul %25, %26, %cst_18 {dimension_numbers = #tpu.dot_dimension_numbers<[1], [1], [0], [0], [0, 0, 1, 0], [], []>} : vector<8x8xbf16>, vector<8x8xbf16>, vector<8x8xf32> -> vector<8x8xf32>
    %c0_19 = arith.constant 0 : index
    %c0_20 = arith.constant 0 : index
    %c0_21 = arith.constant 0 : index
    %28 = vector.load %arg7[%c0_19, %c0_20, %c0_21] : memref<1x8x8xbf16, #tpu.memory_space<vmem>>, vector<1x8x8xbf16>
    %29 = vector.shape_cast %28 : vector<1x8x8xbf16> to vector<8x8xbf16>
    %30 = arith.extf %29 : vector<8x8xbf16> to vector<8x8xf32>
    %31 = arith.addf %27, %30 : vector<8x8xf32>
    %c0_22 = arith.constant 0 : index
    %c0_23 = arith.constant 0 : index
    %c0_24 = arith.constant 0 : index
    %32 = vector.load %arg8[%c0_22, %c0_23, %c0_24] : memref<1x1x8xf32, #tpu.memory_space<vmem>>, vector<1x1x8xf32>
    %33 = vector.shape_cast %32 : vector<1x1x8xf32> to vector<1x8xf32>
    %34 = vector.broadcast %33 : vector<1x8xf32> to vector<8x8xf32>
    %35 = arith.addf %31, %34 : vector<8x8xf32>
    %cst_25 = arith.constant dense<0xFF800000> : vector<8xf32>
    %36 = vector.multi_reduction <maximumf>, %35, %cst_25 [1] : vector<8x8xf32> to vector<8xf32>
    %37 = vector.shape_cast %36 : vector<8xf32> to vector<8x1xf32>
    %38 = vector.broadcast %37 : vector<8x1xf32> to vector<8x8xf32>
    %39 = arith.subf %35, %38 : vector<8x8xf32>
    %40 = math.exp %39 : vector<8x8xf32>
    %cst_26 = arith.constant dense<0.000000e+00> : vector<8xf32>
    %41 = vector.multi_reduction <add>, %40, %cst_26 [1] : vector<8x8xf32> to vector<8xf32>
    %42 = vector.shape_cast %41 : vector<8xf32> to vector<8x1xf32>
    %43 = tpu.reciprocal %42 {approx = true} : vector<8x1xf32> -> vector<8x1xf32>
    %44 = vector.broadcast %43 : vector<8x1xf32> to vector<8x8xf32>
    %45 = arith.mulf %40, %44 : vector<8x8xf32>
    %46 = arith.truncf %45 : vector<8x8xf32> to vector<8x8xbf16>
    %47 = arith.truncf %24 : vector<8x8xf32> to vector<8x8xbf16>
    %cst_27 = arith.constant dense<0.000000e+00> : vector<8x8xf32>
    %48 = tpu.matmul %46, %47, %cst_27 {dimension_numbers = #tpu.dot_dimension_numbers<[1], [0], [0], [1], [0, 0, 1, 1], [], []>} : vector<8x8xbf16>, vector<8x8xbf16>, vector<8x8xf32> -> vector<8x8xf32>
    %c0_i32 = arith.constant 0 : i32
    %49 = arith.cmpi eq, %arg1, %c0_i32 : i32
    %50 = arith.extui %49 : i1 to i32
    %c0_i32_28 = arith.constant 0 : i32
    %51 = arith.cmpi ne, %50, %c0_i32_28 : i32
    scf.if %51 {
      %c0_39 = arith.constant 0 : index
      %c0_40 = arith.constant 0 : index
      %c0_41 = arith.constant 0 : index
      %62 = vector.load %arg10[%c0_39, %c0_40, %c0_41] : memref<1x8x32xf32, #tpu.memory_space<vmem>>, vector<1x8x32xf32>
      %63 = vector.shape_cast %62 : vector<1x8x32xf32> to vector<8x32xf32>
      %64 = vector.shape_cast %1 : vector<8x32xf32> to vector<1x8x32xf32>
      tpu.vector_store %arg10[%c0_39, %c0_40, %c0_41], %64 {strides = array<i32>} : memref<1x8x32xf32, #tpu.memory_space<vmem>>, vector<1x8x32xf32>,
    } else {
    }
    %c0_29 = arith.constant 0 : index
    %c0_30 = arith.constant 0 : index
    %c0_31 = arith.constant 0 : index
    %52 = vector.load %arg10[%c0_29, %c0_30, %c0_31] : memref<1x8x32xf32, #tpu.memory_space<vmem>>, vector<1x8x32xf32>
    %53 = vector.shape_cast %52 : vector<1x8x32xf32> to vector<8x32xf32>
    %54 = arith.truncf %48 : vector<8x8xf32> to vector<8x8xbf16>
    %c0_32 = arith.constant 0 : index
    %c0_33 = arith.constant 0 : index
    %c0_34 = arith.constant 0 : index
    %55 = vector.load %arg9[%c0_32, %c0_33, %c0_34] : memref<1x8x32xbf16, #tpu.memory_space<vmem>>, vector<1x8x32xbf16>
    %56 = vector.shape_cast %55 : vector<1x8x32xbf16> to vector<8x32xbf16>
    %cst_35 = arith.constant dense<0.000000e+00> : vector<8x32xf32>
    %57 = tpu.matmul %54, %56, %cst_35 {dimension_numbers = #tpu.dot_dimension_numbers<[1], [0], [0], [1], [0, 0, 1, 1], [], []>} : vector<8x8xbf16>, vector<8x32xbf16>, vector<8x32xf32> -> vector<8x32xf32>
    %58 = arith.addf %53, %57 : vector<8x32xf32>
    %c0_36 = arith.constant 0 : index
    %c0_37 = arith.constant 0 : index
    %c0_38 = arith.constant 0 : index
    %59 = vector.load %arg10[%c0_36, %c0_37, %c0_38] : memref<1x8x32xf32, #tpu.memory_space<vmem>>, vector<1x8x32xf32>
    %60 = vector.shape_cast %59 : vector<1x8x32xf32> to vector<8x32xf32>
    %61 = vector.shape_cast %58 : vector<8x32xf32> to vector<1x8x32xf32>
    tpu.vector_store %arg10[%c0_36, %c0_37, %c0_38], %61 {strides = array<i32>} : memref<1x8x32xf32, #tpu.memory_space<vmem>>, vector<1x8x32xf32>,
    return
  }
  func.func @transform_0(%arg0: i32, %arg1: i32) -> (i32, i32, i32) {
    %c0_i32 = arith.constant 0 : i32
    %c0_i32_0 = arith.constant 0 : i32
    %c0_i32_1 = arith.constant 0 : i32
    return %arg0, %c0_i32, %c0_i32_0 : i32, i32, i32
  }
  func.func @transform_1(%arg0: i32, %arg1: i32) -> (i32, i32) {
    %c0_i32 = arith.constant 0 : i32
    %c0_i32_0 = arith.constant 0 : i32
    %c0_i32_1 = arith.constant 0 : i32
    return %c0_i32, %c0_i32_0 : i32, i32
  }
  func.func @transform_2(%arg0: i32, %arg1: i32) -> (i32, i32, i32) {
    %c0_i32 = arith.constant 0 : i32
    %c0_i32_0 = arith.constant 0 : i32
    %c0_i32_1 = arith.constant 0 : i32
    return %arg1, %c0_i32, %c0_i32_0 : i32, i32, i32
  }
  func.func @transform_3(%arg0: i32, %arg1: i32) -> (i32, i32, i32) {
    %c0_i32 = arith.constant 0 : i32
    %c0_i32_0 = arith.constant 0 : i32
    %c0_i32_1 = arith.constant 0 : i32
    return %arg1, %c0_i32, %c0_i32_0 : i32, i32, i32
  }
  func.func @transform_4(%arg0: i32, %arg1: i32) -> (i32, i32, i32) {
    %c0_i32 = arith.constant 0 : i32
    %c0_i32_0 = arith.constant 0 : i32
    %c0_i32_1 = arith.constant 0 : i32
    return %arg1, %c0_i32, %c0_i32_0 : i32, i32, i32
  }
  func.func @transform_5(%arg0: i32, %arg1: i32) -> (i32, i32, i32) {
    %c0_i32 = arith.constant 0 : i32
    %c0_i32_0 = arith.constant 0 : i32
    %c0_i32_1 = arith.constant 0 : i32
    return %arg1, %c0_i32, %c0_i32_0 : i32, i32, i32
  }
  func.func @transform_6(%arg0: i32, %arg1: i32) -> (i32, i32, i32) {
    %c0_i32 = arith.constant 0 : i32
    %c0_i32_0 = arith.constant 0 : i32
    %c0_i32_1 = arith.constant 0 : i32
    return %arg0, %c0_i32, %c0_i32_0 : i32, i32, i32
  }
  func.func @transform_7(%arg0: i32, %arg1: i32) -> (i32, i32, i32) {
    %c0_i32 = arith.constant 0 : i32
    %c0_i32_0 = arith.constant 0 : i32
    %c0_i32_1 = arith.constant 0 : i32
    return %arg1, %c0_i32, %c0_i32_0 : i32, i32, i32
  }
  func.func @transform_8(%arg0: i32, %arg1: i32) -> (i32, i32, i32) {
    %c0_i32 = arith.constant 0 : i32
    %c0_i32_0 = arith.constant 0 : i32
    %c0_i32_1 = arith.constant 0 : i32
    return %arg0, %c0_i32, %c0_i32_0 : i32, i32, i32
  }
}

</mosaic_0001>

<bundles_post_ra>
// kernel: tpu_custom_call.1
= control target key start
LH: loop header
LB: loop body
LE: loop exit
PB: predicated region body
PF: predicated region fallthrough
CT: control target
= control target key end

     0   :  { %6 = vsyncpa [#allocation3], 0  ;;  %s124_s0 = inlined_call_operand.hbm [shape: f32[8,128], index: 0, kind: input, shape index: {}]   ;;  %s125_s1 = inlined_call_operand.hbm [shape: f32[8,128], index: 1, kind: output, shape index: {}]  }
   0x1   :  { %7 = vsyncpa [#allocation4], 0  ;;  %s88_s6 = smov [#allocation2]   ;;  %s40_s10 = scalar_lea.hbm %s124_s0, 128 }
   0x2   :  { %s14_s7 = sshll.u32 %s88_s6, 4  ;;  %p41_p0 = scmp.ne.s32.totalorder %s124_s0, %s40_s10  ;;  %s15_s7 = int_to_ptr.vmem [resolvable:$true] %s14_s7 }
   0x3   :  { %p44_p1 = scmp.lt.u32.totalorder %s40_s10, %s124_s0 }
   0x5   :  { %p46_p2 = pnand %p44_p1, %p41_p0 }
   0x7   :  { %49 = shalt.err (!%p46_p2)
}
   0x8   :  { %s50_s15 = scalar_lea.vmem %s15_s7, 128  ;;  %p55_p4 = scmp.lt.s32.totalorder %s15_s7, %s15_s7 }
   0x9   :  { %p51_p3 = scmp.ne.s32.totalorder %s15_s7, %s50_s15  ;;  %p56_p5 = scmp.lt.s32.totalorder %s50_s15, %s50_s15 }
   0xb   :  { %p57_p6 = por %p56_p5, %p55_p4 }
   0xd   :  { %p58_p7 = pnand %p57_p6, %p51_p3 }
   0xf   :  { %61 = shalt.err (!%p58_p7)
}
  0x10   :  { %17 = dma.hbm_to_vmem [thread:$0]  %s124_s0, 128, %s15_s7, [#allocation3]  }
  0x11   :  { %84 = dma.done.wait [#allocation3], 128  }
  0x12   :  { %85 = vsyncadd [#allocation3], 4294967168  ;;  %s89_s18 = smov [#allocation5]   ;;  %v21_v0 = vld [vmem:[#allocation2] sm:$0xff] }
  0x13   :  { %s29_s19 = sshll.u32 %s89_s18, 4  ;;  %22 = vst [vmem:[#allocation5] sm:$0xff] %v21_v0  ;;  %s30_s19 = int_to_ptr.vmem [resolvable:$true] %s29_s19 }
  0x14   :  { %s62_s20 = scalar_lea.vmem %s30_s19, 128  ;;  %p67_p9 = scmp.lt.s32.totalorder %s30_s19, %s30_s19 }
  0x15   :  { %p63_p8 = scmp.ne.s32.totalorder %s30_s19, %s62_s20  ;;  %p68_p10 = scmp.lt.s32.totalorder %s62_s20, %s62_s20 }
  0x17   :  { %p69_p11 = por %p68_p10, %p67_p9 }
  0x19   :  { %p70_p12 = pnand %p69_p11, %p63_p8 }
  0x1b   :  { %73 = shalt.err (!%p70_p12)
}
  0x1c   :  { %s74_s23 = scalar_lea.hbm %s125_s1, 128 }
  0x1d   :  { %p75_p13 = scmp.ne.s32.totalorder %s125_s1, %s74_s23  ;;  %p78_p0 = scmp.lt.u32.totalorder %s74_s23, %s125_s1 }
  0x1f   :  { %p80_p1 = pnand %p78_p0, %p75_p13 }
  0x21   :  { %83 = shalt.err (!%p80_p1)
}
  0x22   :  { %32 = dma.vmem_to_hbm [thread:$0]  %s30_s19, 128, %s125_s1, [#allocation4]  }
  0x23   :  { %86 = dma.done.wait [#allocation4], 128  }
  0x24   :  { %87 = vsyncadd [#allocation4], 4294967168 }
  0x25   :  { %36 = vsyncpa [#allocation3], 1 }
  0x26   :  { %37 = vsyncpa [#allocation4], 1 }

// kernel: t5_binary_cls_forward.9
= control target key start
LH: loop header
LB: loop body
LE: loop exit
PB: predicated region body
PF: predicated region fallthrough
CT: control target
= control target key end

     0   :  { %vm21_vm0 = vcmask 254976   ;;  %vm57_vm1 = vcmask 1024   ;;  %s110_s0 = inlined_call_operand.vmem [shape: f32[2,32], index: 0, kind: input, shape index: {}]   ;;  %s111_s3 = inlined_call_operand.<no memory space> [shape: f32[1,1], index: 3, kind: input, shape index: {}]   ;;  %s112_s1 = inlined_call_operand.vmem [shape: f32[1,32], index: 1, kind: input, shape index: {}]   ;;  %s113_s2 = inlined_call_operand.vmem [shape: f32[1,32], index: 2, kind: input, shape index: {}]   ;;  %s114_s4 = inlined_call_operand.vmem [shape: f32[2,1], index: 4, kind: output, shape index: {}]  }
   0x1   :  { %v19_v0 = vld [vmem:[%s110_s0] sm:$0x3]  ;;  %v9_v3 = vstv %s111_s3 }
   0x2   :  { %v20_v1 = vmul.f32 %v19_v0, %v19_v0  ;;  %10 = vst [vmem:[#allocation2] sm:$0x1] %v9_v3  ;;  %v63_v8 = vld [vmem:[%s112_s1] ss:$0 sm:$0xff] }
   0x3   :  { %v64_v10 = vld [vmem:[%s113_s2] ss:$0 sm:$0xff] }
   0x4   :  { %v22_v2 = vsel %vm21_vm0, %v20_v1, 0.0 }
   0x5   :  { %23 = vadd.xlane.f32.xlu0 %v22_v2 }
   0x9   :  { %v65_v14 = vld [vmem:[#allocation2] ss:$0 sm:$0xff] }
  0x92   :  { %v24_v4 = vpop.xlane.xlu0 %23 }
  0x93   :  { %v26_v5 = vmul.f32 0.03125, %v24_v4 }
  0x95   :  { %v27_v6 = vadd.f32 1e-06, %v26_v5 }
  0x97   :  { %66 = vrsqrt.f32 %v27_v6 }
  0xa1   :  { %v67_v7 = vpop.eup %66 }
  0xa2   :  { %v29_v9 = vmul.f32 %v67_v7, %v19_v0 }
  0xa4   :  { %v37_v11 = vmul.f32 %v63_v8, %v29_v9 }
  0xa6   :  { %v45_v12 = vmul.f32 %v64_v10, %v37_v11 }
  0xa8   :  { %v46_v13 = vsel %vm21_vm0, %v45_v12, 0.0 }
  0xa9   :  { %47 = vadd.xlane.f32.xlu0 %v46_v13 }
 0x136   :  { %v48_v15 = vpop.xlane.xlu0 %47 }
 0x137   :  { %v56_v16 = vadd.f32 %v65_v14, %v48_v15 }
 0x139   :  { %58 = vst.msk [vmem:[%s114_s4] sm:$0x3] %vm57_vm1, %v56_v16 }

// kernel: t5_binary_cls_forward.6
= control target key start
LH: loop header
LB: loop body
LE: loop exit
PB: predicated region body
PF: predicated region fallthrough
CT: control target
= control target key end

     0   :  { %vm22_vm0 = vcmask 261120   ;;  %v243_v6 = vmov 0.0   ;;  %vm244_vm1 = vmmov 0   ;;  %vm143_vm2 = vcmask 523264   ;;  %s314_s0 = inlined_call_operand.vmem [shape: f32[16,32], index: 0, kind: input, shape index: {}]   ;;  %s315_s2 = inlined_call_operand.vmem [shape: bf16[32,64], index: 2, kind: input, shape index: {}]   ;;  %s316_s3 = inlined_call_operand.vmem [shape: bf16[64,32], index: 3, kind: input, shape index: {}]   ;;  %s317_s1 = inlined_call_operand.vmem [shape: f32[1,32], index: 1, kind: input, shape index: {}]   ;;  %s318_s4 = inlined_call_operand.vmem [shape: f32[16,32], index: 4, kind: output, shape index: {}]  }
   0x1   :  { %v18_v0 = vld [vmem:[%s314_s0] sm:$0xff]  ;;  %v276_v1 = vld [vmem:[%s314_s0 + $0x8] sm:$0xff]  ;;  %211 = vmatprep.subr.bf16.mxu0 %v243_v6  ;;  %215 = vmatprep.mubr.msk.bf16.mxu0 %vm244_vm1, %v243_v6  ;;  %v237_v25 = vld [vmem:[%s316_s3 + $0x10] sm:$0xff]  }
   0x2   :  { %v20_v2 = vmul.f32 %v18_v0, %v18_v0  ;;  %v21_v3 = vmul.f32 %v276_v1, %v276_v1  ;;  %v233_v7 = vld [vmem:[%s315_s2] sm:$0xff]   ;;  %219 = vmatprep.subr.bf16.mxu1 %v243_v6  ;;  %227 = vmatprep.mubr.msk.bf16.mxu1 %vm244_vm1, %v243_v6  ;;  %v234_v8 = vld [vmem:[%s315_s2 + $0x8] sm:$0xff]   ;;  %v238_v26 = vld [vmem:[%s316_s3 + $0x18] sm:$0xff]  }
   0x3   :  { %212 = vmatpush3.bf16.msra.mxu0 %v233_v7  ;;  %v235_v9 = vld [vmem:[%s316_s3] sm:$0xff]   ;;  %v236_v10 = vld [vmem:[%s316_s3 + $0x8] sm:$0xff]  }
   0x4   :  { %v23_v4 = vsel %vm22_vm0, %v20_v2, 0.0  ;;  %v26_v5 = vsel %vm22_vm0, %v21_v3, 0.0  ;;  %213 = vmatprep.subr.bf16.mxu0 %v243_v6  ;;  %220 = vmatpush3.bf16.msra.mxu1 %v235_v9  ;;  %v194_v20 = vld [vmem:[%s317_s1] ss:$0 sm:$0xff] }
   0x5   :  { %24 = vadd.xlane.f32.xlu0 %v23_v4  ;;  %221 = vmatprep.subr.bf16.mxu1 %v243_v6 }
   0x7   :  { %214 = vmatpush3.bf16.msra.mxu0 %v234_v8 }
   0x8   :  { %222 = vmatpush3.bf16.msra.mxu1 %v236_v10 }
   0x9   :  { %27 = vadd.xlane.f32.xlu0 %v26_v5  ;;  %223 = vmatprep.subr.bf16.mxu1 %v243_v6 }
   0xc   :  { %224 = vmatpush3.bf16.msra.mxu1 %v237_v25 }
   0xd   :  { %225 = vmatprep.subr.bf16.mxu1 %v243_v6 }
  0x10   :  { %226 = vmatpush3.bf16.msra.mxu1 %v238_v26 }
  0x92   :  { %v25_v11 = vpop.xlane.xlu0 %24 }
  0x93   :  { %v30_v12 = vmul.f32 0.03125, %v25_v11 }
  0x95   :  { %v32_v13 = vadd.f32 1e-06, %v30_v12 }
  0x96   :  { %v28_v14 = vpop.xlane.xlu0 %27 }
  0x97   :  { %239 = vrsqrt.f32 %v32_v13  ;;  %v31_v15 = vmul.f32 0.03125, %v28_v14 }
  0x99   :  { %v33_v16 = vadd.f32 1e-06, %v31_v15 }
  0x9b   :  { %241 = vrsqrt.f32 %v33_v16 }
  0xa1   :  { %v240_v17 = vpop.eup %239 }
  0xa2   :  { %v36_v18 = vmul.f32 %v240_v17, %v18_v0 }
  0xa4   :  { %v45_v22 = vmul.f32 %v194_v20, %v36_v18 }
  0xa5   :  { %v242_v19 = vpop.eup %241 }
  0xa6   :  { %v37_v21 = vmul.f32 %v242_v19, %v276_v1 }
  0xa8   :  { %v46_v23 = vmul.f32 %v194_v20, %v37_v21 }
  0xaa   :  { %v47_v24 = vpack.c.bf16 %v46_v23, %v45_v22 }
  0xac   :  { %216 = vmatmul.mubr.msk.bf16.vlgmr.msra.gmra.mrb[0].mxu0 %vm22_vm0, %v47_v24 }
 0x17f   :  { %v101_v27 = vpop.f32.mrb[0].mxu0 }
 0x180   :  { %v217_v28 = vpop.f32.mrb[1].mxu0  ;;  %v108_v30 = vmax.f32 %v101_v27, 0.0 }
 0x181   :  { %v104_v29 = vpop.f32.mrb[2].mxu0 }
 0x182   :  { %v109_v31 = vmax.f32 %v104_v29, 0.0  ;;  %v218_v32 = vpop.f32.mrb[3].mxu0 }
 0x184   :  { %v110_v33 = vpack.c.bf16 %v109_v31, %v108_v30 }
 0x186   :  { %228 = vmatmul.mubr.msk.bf16.vlgmr.msra.gmra.mrb[0].mxu1 %vm143_vm2, %v110_v33 }
 0x259   :  { %v181_v34 = vpop.f32.mrb[0].mxu1 }
 0x25a   :  { %v182_v35 = vadd.f32 %v181_v34, %v18_v0  ;;  %v229_v36 = vpop.f32.mrb[1].mxu1 }
 0x25b   :  { %v184_v37 = vpop.f32.mrb[2].mxu1 }
 0x25c   :  { %188 = vst.msk [vmem:[%s318_s4] sm:$0xff] %vm22_vm0, %v182_v35  ;;  %v185_v38 = vadd.f32 %v184_v37, %v276_v1  ;;  %v230_v39 = vpop.f32.mrb[3].mxu1 }
 0x25e   :  { %189 = vst.msk [vmem:[%s318_s4 + $0x8] sm:$0xff] %vm22_vm0, %v185_v38 }

// kernel: t5_binary_cls_forward.5
= control target key start
LH: loop header
LB: loop body
LE: loop exit
PB: predicated region body
PF: predicated region fallthrough
CT: control target
= control target key end

     0   :  { %s1154_s27 = smov 0   ;;  %s1156_s28 = smov 0   ;;  %s1288_s0 = inlined_call_operand.vmem [shape: f32[2,8,32], index: 0, kind: input, shape index: {}]   ;;  %s1289_s1 = inlined_call_operand.vmem [shape: f32[1,32], index: 1, kind: input, shape index: {}]   ;;  %s1290_s2 = inlined_call_operand.vmem [shape: bf16[4,32,8], index: 2, kind: input, shape index: {}]   ;;  %s1291_s3 = inlined_call_operand.vmem [shape: bf16[4,32,8], index: 3, kind: input, shape index: {}]   ;;  %s1292_s4 = inlined_call_operand.vmem [shape: bf16[4,32,8], index: 4, kind: input, shape index: {}]   ;;  %s1293_s5 = inlined_call_operand.vmem [shape: bf16[4,8,8], index: 5, kind: input, shape index: {}]   ;;  %s1294_s6 = inlined_call_operand.vmem [shape: f32[2,1,8], index: 6, kind: input, shape index: {}]   ;;  %s1295_s7 = inlined_call_operand.vmem [shape: bf16[4,8,32], index: 7, kind: input, shape index: {}]   ;;  %s1296_s8 = inlined_call_operand.vmem [shape: f32[2,8,32], index: 8, kind: output, shape index: {}]  }
   0x1   :  { %s1158_s29 = smov 0   ;;  %s1160_s30 = smov 0  }
   0x2   :  { %s1162_s9 = smov 0  }
   0x3 LB: > { %s27_s10 = sadd.s32 1, %s1097_s29  ;;  %s30_s11 = sadd.s32 1, %s1101_s30  ;;  %s1105_s9 = sphi %s1162_s9, %s18_s9   ;;  %s1101_s30 = sphi %s1160_s30, %s1300_s30   ;;  %s1097_s29 = sphi %s1158_s29, %s1299_s29   ;;  %s1093_s28 = sphi %s1156_s28, %s1298_s28   ;;  %s1089_s27 = sphi %s1154_s27, %s1297_s27  }
   0x4   : > { %p28_p0 = scmp.ge.s32.totalorder %s27_s10, 4  ;;  %p925_p1 = scmp.ge.s32.totalorder %s1105_s9, 1 }
   0x5   : > { %p329_p2 = scmp.lt.s32.totalorder %s1105_s9, 9 }
   0x6   : > { %s1302_s10 = smov (%p28_p0, %s27_s10), 0  ;;  %s1304_s11 = smov (!%p28_p0, %s30_s11), %s1101_s30 }
   0x7   : > { %p330_p3 = pnand %p925_p1, %p329_p2  ;;  %p32_p4 = scmp.ge.s32.totalorder %s1304_s11, 2 }
   0x8   : > { %p387_p5 = scmp.lt.s32.totalorder (!%p330_p3), %s1093_s28, 1  ;;  %vm424_vm0 = vcmask (!%p330_p3), 261120   ;;  %p391_p6 = scmp.lt.s32.totalorder (!%p330_p3), %s1089_s27, 3  ;;  %v1107_v3 = vmov (!%p330_p3), 0.0   ;;  %vm1108_vm1 = vmmov (!%p330_p3), 0   ;;  %vm617_vm2 = vcmask (!%p330_p3), 64512  }
   0x9   : > { %s1306_s11 = smov (%p32_p4, %s1304_s11), 0  ;;  %333 = sbr.rel (%p330_p3) target bundleno = 1375 (0x55f), region = 52 }
   0xa   : > { %971 = vmatprep.subr.bf16.mxu0 (!%p330_p3), %v1107_v3  ;;  %979 = vmatprep.subr.bf16.mxu1 (!%p330_p3), %v1107_v3  ;;  %v936_v12 = vld [vmem:[%s1289_s1] ss:$0 sm:$0xff] (!%p330_p3)  ;;  %vm688_vm3 = vcmask (!%p330_p3), 1043456   ;;  %p949_p7 = scmp.ne.s32.totalorder (!%p330_p3), %s1089_s27, 0 }
   0xb   : > { %975 = vmatprep.mubr.msk.bf16.mxu0 (!%p330_p3), %vm1108_vm1, %v1107_v3  ;;  %983 = vmatprep.mubr.msk.bf16.mxu1 (!%p330_p3), %vm1108_vm1, %v1107_v3 }
  0x10   : > { %s1308_s28 = smov (!%p387_p5, %s1093_s28), 1 }
  0x11   : > { %s926_s12 = sshll.u32 %s1308_s28, 3 }
  0x12   : > { %s390_s15 = scalar_lea.vmem %s1288_s0, %s926_s12  ;;  %s1195_s18 = scalar_lea.vmem %s1296_s8, %s926_s12 }
  0x13   : > { %v1197_v0 = vld [vmem:[%s390_s15] sm:$0xff]  ;;  %s1206_s19 = scalar_select %p391_p6, %s1089_s27, 3 }
  0x14   : > { %v423_v1 = vmul.f32 %v1197_v0, %v1197_v0  ;;  %s412_s12 = scalar_lea.vmem %s1294_s6, %s1308_s28  ;;  %736 = vst.msk [vmem:[%s1195_s18] sm:$0xff] (!%p949_p7), %vm424_vm0, %v1197_v0 }
  0x15   : > { %s953_s20 = sshll.u32 %s1206_s19, 4  ;;  %s933_s17 = sshll.u32 %s1206_s19, 2  ;;  %v947_v38 = vld [vmem:[%s412_s12] ss:$0 sm:$0xff] }
  0x16   : > { %v425_v2 = vsel %vm424_vm0, %v423_v1, 0.0  ;;  %s395_s23 = scalar_lea.vmem %s1290_s2, %s953_s20  ;;  %s400_s26 = scalar_lea.vmem %s1291_s3, %s953_s20 }
  0x17   : > { %426 = vadd.xlane.f32.xlu0 %v425_v2  ;;  %v1055_v4 = vld [vmem:[%s395_s23] sm:$0xff]   ;;  %v1057_v6 = vld [vmem:[%s395_s23 + $0x8] sm:$0xff]   ;;  %s405_s14 = scalar_lea.vmem %s1292_s4, %s953_s20  ;;  %s1245_s22 = scalar_lea.vmem %s1295_s7, %s933_s17 }
  0x18   : > { %v1056_v5 = vld [vmem:[%s400_s26] sm:$0xff]   ;;  %972 = vmatpush3.bf16.msra.mxu0 %v1055_v4  ;;  %v1058_v7 = vld [vmem:[%s400_s26 + $0x8] sm:$0xff]   ;;  %s409_s24 = scalar_lea.vmem %s1293_s5, %s933_s17 }
  0x19   : > { %980 = vmatpush3.bf16.msra.mxu1 %v1056_v5  ;;  %973 = vmatprep.subr.bf16.mxu0 %v1107_v3  ;;  %v1059_v15 = vld [vmem:[%s405_s14] sm:$0xff]   ;;  %v1060_v17 = vld [vmem:[%s405_s14 + $0x8] sm:$0xff]  }
  0x1a   : > { %981 = vmatprep.subr.bf16.mxu1 %v1107_v3  ;;  %v615_v35 = vld [vmem:[%s409_s24] sm:$0xf] }
  0x1b   : > { %v616_v36 = vunpack.c.l.bf16 %v615_v35 }
  0x1c   : > { %974 = vmatpush3.bf16.msra.mxu0 %v1057_v6 }
  0x1d   : > { %982 = vmatpush3.bf16.msra.mxu1 %v1058_v7  ;;  %987 = vmatprep.subr.bf16.mxu0 %v1107_v3 }
  0x1e   : > { %995 = vmatprep.subr.bf16.mxu1 %v1107_v3 }
  0xa4   : > { %v427_v8 = vpop.xlane.xlu0 %426 }
  0xa5   : > { %v429_v9 = vmul.f32 0.03125, %v427_v8 }
  0xa7   : > { %v430_v10 = vadd.f32 1e-06, %v429_v9 }
  0xa9   : > { %1061 = vrsqrt.f32 %v430_v10 }
  0xb3   : > { %v1062_v11 = vpop.eup %1061 }
  0xb4   : > { %v432_v13 = vmul.f32 %v1062_v11, %v1197_v0 }
  0xb6   : > { %v440_v14 = vmul.f32 %v936_v12, %v432_v13 }
  0xb8   : > { %v441_v16 = vpack.c.bf16 %v440_v14, %v440_v14 }
  0xba   : > { %976 = vmatmul.mubr.msk.bf16.vlgmr.msra.gmra.mrb[0].mxu0 %vm424_vm0, %v441_v16  ;;  %984 = vmatmul.mubr.msk.bf16.vlgmr.msra.gmra.mrb[0].mxu1 %vm424_vm0, %v441_v16 }
  0xbb   : > { %988 = vmatpush3.bf16.msra.mxu0 %v1059_v15  ;;  %991 = vmatprep.mubr.msk.bf16.mxu0 %vm1108_vm1, %v1107_v3 }
  0xbc   : > { %989 = vmatprep.subr.bf16.mxu0 %v1107_v3  ;;  %997 = vmatprep.mubr.msk.bf16.mxu1 %vm1108_vm1, %v1107_v3 }
  0xbf   : > { %990 = vmatpush3.bf16.msra.mxu0 %v1060_v17 }
  0xc0   : > { %1001 = vmatprep.subr.bf16.mxu0 %v1107_v3 }
  0xc2   : > { %992 = vmatmul.mubr.msk.bf16.vlgmr.msra.gmra.mrb[4].mxu0 %vm424_vm0, %v441_v16 }
  0xc3   : > { %1003 = vmatprep.mubr.msk.bf16.mxu0 %vm1108_vm1, %v1107_v3 }
 0x18d   : > { %v495_v18 = vpop.f32.mrb[0].mxu0  ;;  %v551_v19 = vpop.f32.mrb[0].mxu1 }
 0x18e   : > { %v614_v20 = vpack.c.bf16 %v551_v19, %v551_v19  ;;  %v977_v21 = vpop.f32.mrb[1].mxu0  ;;  %v985_v22 = vpop.f32.mrb[1].mxu1  ;;  %v613_v29 = vpack.c.bf16 %v495_v18, %v495_v18 }
 0x18f   : > { %v498_v23 = vpop.f32.mrb[2].mxu0  ;;  %v554_v24 = vpop.f32.mrb[2].mxu1 }
 0x190   : > { %v622_v25 = vsel %vm617_vm2, %v614_v20, 0  ;;  %v978_v26 = vpop.f32.mrb[3].mxu0  ;;  %v986_v27 = vpop.f32.mrb[3].mxu1 }
 0x191   : > { %996 = vmatpush3.bf16.xpose.msra.mxu1 %v622_v25 }
 0x195   : > { %v607_v28 = vpop.f32.mrb[4].mxu0 }
 0x196   : > { %v684_v30 = vpack.c.bf16 %v607_v28, %v607_v28  ;;  %v993_v31 = vpop.f32.mrb[5].mxu0 }
 0x197   : > { %v610_v32 = vpop.f32.mrb[6].mxu0 }
 0x198   : > { %v690_v33 = vsel %vm688_vm3, %v684_v30, 0  ;;  %v994_v34 = vpop.f32.mrb[7].mxu0  ;;  %998 = vmatmul.mubr.msk.bf16.vlgmr.msra.gmra.mrb[4].mxu1 %vm617_vm2, %v613_v29 }
 0x199   : > { %1002 = vmatpush3.bf16.msra.mxu0 %v690_v33 }
 0x26b   : > { %v658_v37 = vpop.f32.mrb[4].mxu1 }
 0x26c   : > { %v659_v39 = vadd.f32 %v658_v37, %v616_v36  ;;  %v999_v40 = vpop.f32.mrb[5].mxu1 }
 0x26d   : > { %v661_v41 = vpop.f32.mrb[6].mxu1 }
 0x26e   : > { %v1000_v42 = vpop.f32.mrb[7].mxu1  ;;  %v671_v43 = vadd.f32 %v947_v38, %v659_v39 }
 0x270   : > { %v672_v44 = vsel %vm617_vm2, %v671_v43, -inf }
 0x271   : > { %673 = vmax.xlane.f32.xlu0 %v672_v44 }
 0x2fe   : > { %v674_v45 = vpop.xlane.xlu0 %673 }
 0x2ff   : > { %v675_v46 = vsub.f32 %v671_v43, %v674_v45 }
 0x301   : > { %v676_v47 = vmul.f32 1.442695, %v675_v46 }
 0x303   : > { %1063 = vpow2.f32 %v676_v47 }
 0x30d   : > { %v1064_v48 = vpop.eup %1063 }
 0x30e   : > { %v678_v49 = vsel %vm617_vm2, %v1064_v48, 0.0 }
 0x30f   : > { %679 = vadd.xlane.f32.xlu1 %v678_v49 }
 0x39c   : > { %v680_v50 = vpop.xlane.xlu1 %679 }
 0x39d   : > { %1065 = vrcp.f32 %v680_v50 }
 0x3a7   : > { %v1066_v51 = vpop.eup %1065 }
 0x3a8   : > { %v682_v52 = vmul.f32 %v1066_v51, %v1064_v48 }
 0x3aa   : > { %v683_v53 = vpack.c.bf16 %v682_v52, %v682_v52 }
 0x3ac   : > { %1004 = vmatmul.mubr.msk.bf16.vlgmr.msra.gmra.mrb[8].mxu0 %vm617_vm2, %v683_v53 }
 0x47c   : > { %735 = sbr.rel (%p949_p7) target bundleno = 1155 (0x483), region = 56 }
 0x47f   : > { %v726_v54 = vpop.f32.mrb[8].mxu0 }
 0x480   : > { %v1005_v55 = vpop.f32.mrb[9].mxu0 }
 0x481   : > { %v729_v56 = vpop.f32.mrb[10].mxu0 }
 0x482   : > { %v1006_v57 = vpop.f32.mrb[11].mxu0 }
 0x483 PF: > { %1007 = vmatprep.subr.bf16.mxu1 %v1107_v3  ;;  %v739_v58 = vld [vmem:[%s1245_s22] sm:$0xf]  ;;  %1009 = vmatprep.mubr.msk.bf16.mxu1 %vm1108_vm1, %v1107_v3  ;;  %v738_v60 = vpack.c.bf16 %v726_v54, %v726_v54 }
 0x484   : > { %v744_v59 = vsel %vm688_vm3, %v739_v58, 0  ;;  %v737_v61 = vld [vmem:[%s1195_s18] sm:$0xff] }
 0x485   : > { %1008 = vmatpush3.bf16.msra.mxu1 %v744_v59 }
 0x488   : > { %1010 = vmatmul.mubr.msk.bf16.vlgmr.msra.gmra.mrb[8].mxu1 %vm617_vm2, %v738_v60 }
 0x55b   : > { %v780_v62 = vpop.f32.mrb[8].mxu1 }
 0x55c   : > { %v786_v63 = vadd.f32 %v780_v62, %v737_v61  ;;  %v1011_v0 = vpop.f32.mrb[9].mxu1 }
 0x55d   : > { %v783_v1 = vpop.f32.mrb[10].mxu1 }
 0x55e   : > { %787 = vst.msk [vmem:[%s1195_s18] sm:$0xff] %vm424_vm0, %v786_v63  ;;  %v1012_v2 = vpop.f32.mrb[11].mxu1 }
 0x55f PF: > { %s18_s9 = sadd.s32 1, %s1105_s9   ;;  %s1297_s27 = smov %s1097_s29 }
 0x560   : > { %p15_p8 = scmp.ge.s32.totalorder %s18_s9, 10   ;;  %s1298_s28 = smov %s1101_s30 }
 0x561   : > { %s1299_s29 = smov %s1302_s10  ;;  %s1300_s30 = smov %s1306_s11 }
 0x562   :  { %17 = sbr.rel (!%p15_p8) target bundleno = 3 (0x3), region = 104 }

</bundles_post_ra>
